<compile_context>
chip_gen: v7x
topology: tpu7x:2x2x1
jax: 0.10.0
libtpu: 0.0.40
codegen_flags: <defaults>
</compile_context>

<pallas_src>
import functools

import jax
import jax.numpy as jnp
from jax import lax
from jax.experimental import pallas as pl
from jax.experimental.pallas import tpu as pltpu


def _round_up(x, m):
    return (x + m - 1) // m * m


def _dsconv_kernel(x_ref, wdw_ref, wpw_ref, o_ref, *, k, wp, c_in, c_out,
                   l_out):
    """Fused depthwise(kxk) + pointwise(1x1) conv in flat (C, L) layout.

    x_ref  : (1, C_in, L_in)   zero-padded, row-major-flattened activations
                               (batch folded onto the flat/lane axis)
    wdw_ref: (C_in, k*k)       depthwise taps, row-major over (kh, kw)
    wpw_ref: (C_out, C_in)     pointwise (1x1) weights
    o_ref  : (1, C_out, L_out) dense (stride-1) depthwise+pointwise output on
                               the padded grid; seam columns removed in wrapper
    """
    x = x_ref[0].astype(jnp.float32)          # (C_in, L_in)
    wdw = wdw_ref[...].astype(jnp.float32)    # (C_in, k*k)
    wpw = wpw_ref[...].astype(jnp.float32)    # (C_out, C_in)

    # Depthwise: k*k shifted contiguous slices, each scaled per-channel (VPU).
    acc = jnp.zeros((c_in, l_out), jnp.float32)
    for kh in range(k):
        for kw in range(k):
            d = kh * wp + kw                  # static lane offset
            t = kh * k + kw
            acc = acc + x[:, d:d + l_out] * wdw[:, t:t + 1]

    # Pointwise 1x1: C_in broadcast FMAs on the VPU; result is (C_out, L_out)
    # with a lane-dense last dim (multiple of 128).
    out = jnp.zeros((c_out, l_out), jnp.float32)
    for c in range(c_in):
        out = out + wpw[:, c:c + 1] * acc[c:c + 1, :]

    o_ref[0] = out.astype(o_ref.dtype)


def _pick_batch_block(n, c_in, c_out, lseg, wp, k, vmem_budget_bytes):
    """Largest divisor of n whose (double-buffered) slab fits the budget."""
    best = 1
    for bb in range(1, n + 1):
        if n % bb:
            continue
        l_out = _round_up(bb * lseg, 128)
        l_in = _round_up(l_out + (k - 1) * (wp + 1), 128)
        in_bytes = c_in * l_in * 4
        out_bytes = c_out * l_out * 4
        if 2 * (in_bytes + out_bytes) <= vmem_budget_bytes:
            best = bb
    return best


def dsconv_pallas(x_nchw, w_dw, w_pw, *, s, k, p, batch_block=None,
                  vmem_budget_bytes=16 << 20):
    """DSConv forward.

    x_nchw: (N, C_in, H, W); w_dw: (C_in, 1, k, k); w_pw: (C_out, C_in, 1, 1).
    Returns (N, C_out, H_out, W_out) NCHW, matching the PyTorch module.
    """
    n, c_in, h, w = x_nchw.shape
    c_out = w_pw.shape[0]
    hp, wp = h + 2 * p, w + 2 * p
    h_out = (h + 2 * p - k) // s + 1
    w_out = (w + 2 * p - k) // s + 1
    hd, wd = hp - k + 1, wp - k + 1          # dense (stride-1) output extent

    lseg = hp * wp                           # flat length of one padded image
    if batch_block is None:
        batch_block = _pick_batch_block(n, c_in, c_out, lseg, wp, k,
                                        vmem_budget_bytes)
    assert n % batch_block == 0
    nb, bb = n // batch_block, batch_block

    l_out = _round_up(bb * lseg, 128)        # lane-dense output width
    overhang = (k - 1) * (wp + 1)            # max tap offset past acc end
    l_in = _round_up(l_out + overhang, 128)  # lane-dense input width

    # NCHW -> zero pad -> flatten each image row-major -> fold batch onto the
    # flat (lane) axis; channels stay on sublanes: (NB, C_in, L_in).
    x_pad = jnp.pad(x_nchw, ((0, 0), (0, 0), (p, p), (p, p)))
    x_flat = x_pad.reshape(nb, bb, c_in, lseg)
    x_flat = jnp.transpose(x_flat, (0, 2, 1, 3)).reshape(nb, c_in, bb * lseg)
    x_flat = jnp.pad(x_flat, ((0, 0), (0, 0), (0, l_in - bb * lseg)))

    wdw_flat = w_dw[:, 0].reshape(c_in, k * k)      # (C_in, k*k)
    wpw_mat = w_pw[:, :, 0, 0]                      # (C_out, C_in)

    kernel = functools.partial(_dsconv_kernel, k=k, wp=wp, c_in=c_in,
                               c_out=c_out, l_out=l_out)

    out_flat = pl.pallas_call(
        kernel,
        out_shape=jax.ShapeDtypeStruct((nb, c_out, l_out), x_nchw.dtype),
        grid_spec=pltpu.PrefetchScalarGridSpec(
            num_scalar_prefetch=0,
            grid=(nb,),
            in_specs=[
                pl.BlockSpec((1, c_in, l_in), lambda i: (i, 0, 0)),
                pl.BlockSpec((c_in, k * k), lambda i: (0, 0)),
                pl.BlockSpec((c_out, c_in), lambda i: (0, 0)),
            ],
            out_specs=pl.BlockSpec((1, c_out, l_out), lambda i: (i, 0, 0)),
        ),
        compiler_params=pltpu.CompilerParams(
            dimension_semantics=("parallel",)),
    )(x_flat, wdw_flat, wpw_mat)

    # Unflatten: drop lane padding, split batch back out, cut padded-grid seam
    # columns/rows, then apply the conv stride (dense output subsampled).
    out = out_flat[:, :, :bb * lseg].reshape(nb, c_out, bb, hp, wp)
    out = jnp.transpose(out, (0, 2, 1, 3, 4)).reshape(n, c_out, hp, wp)
    out = out[:, :, :hd, :wd]
    if s > 1:
        # TODO(synk): s>1 does s^2 redundant dense depthwise work in-kernel;
        # acceptable for small s, restride inside the kernel for large s.
        out = out[:, :, ::s, ::s]
    return out[:, :, :h_out, :w_out]


def dsconv_reference(x_nchw, w_dw, w_pw, *, s, k, p):
    """Plain-JAX reference matching nn.Conv2d (bias=False) semantics."""
    c_in = x_nchw.shape[1]
    dw = lax.conv_general_dilated(
        x_nchw, w_dw, window_strides=(s, s), padding=[(p, p), (p, p)],
        feature_group_count=c_in,
        dimension_numbers=("NCHW", "OIHW", "NCHW"))
    pw = lax.conv_general_dilated(
        dw, w_pw, window_strides=(1, 1), padding=[(0, 0), (0, 0)],
        dimension_numbers=("NCHW", "OIHW", "NCHW"))
    return pw


if __name__ == "__main__":
    # Module config: DSConv(in_channel=4, out_channel=8, s=1, k=3, p=1)
    N, C_IN, C_OUT, H, W = 2, 4, 8, 16, 16
    S, K, P = 1, 3, 1

    key = jax.random.PRNGKey(0)
    kx, kd, kp = jax.random.split(key, 3)
    x = jax.random.normal(kx, (N, C_IN, H, W), dtype=jnp.float32)
    # nn.Conv2d weight shapes: depthwise (C_in, 1, k, k); pointwise (C_out, C_in, 1, 1)
    w_dw = jax.random.normal(kd, (C_IN, 1, K, K), dtype=jnp.float32) * 0.1
    w_pw = jax.random.normal(kp, (C_OUT, C_IN, 1, 1), dtype=jnp.float32) * 0.1

    out = dsconv_pallas(x, w_dw, w_pw, s=S, k=K, p=P)
    out = jax.block_until_ready(out)

    ref = dsconv_reference(x, w_dw, w_pw, s=S, k=K, p=P)
    assert out.shape == ref.shape == (N, C_OUT, H, W)
    assert jnp.allclose(out, ref, atol=1e-4, rtol=1e-4)

    print("KERNEL_OK")
</pallas_src>

<mosaic_0001>
module attributes {stable_mosaic.version = 11 : i64} {
  func.func @_dsconv_kernel(%arg0: i32, %arg1: memref<1x4x896xf32, #tpu.memory_space<vmem>>, %arg2: memref<4x9xf32, #tpu.memory_space<vmem>>, %arg3: memref<8x4xf32, #tpu.memory_space<vmem>>, %arg4: memref<1x8x768xf32, #tpu.memory_space<vmem>>) attributes {dimension_semantics = [#tpu.dimension_semantics<parallel>], iteration_bounds = array<i64: 1>, scalar_prefetch = 0 : i64, scratch_operands = 0 : i64, tpu.core_type = #tpu.core_type<tc>, window_params = [{transform_indices = @transform_0, window_bounds = array<i64: 1, 4, 896>}, {pipeline_mode = #tpu.pipeline_mode<synchronous>, transform_indices = @transform_1, window_bounds = array<i64: 4, 9>}, {pipeline_mode = #tpu.pipeline_mode<synchronous>, transform_indices = @transform_2, window_bounds = array<i64: 8, 4>}, {transform_indices = @transform_3, window_bounds = array<i64: 1, 8, 768>}]} {
    %c0 = arith.constant 0 : index
    %c0_0 = arith.constant 0 : index
    %c0_1 = arith.constant 0 : index
    %0 = vector.load %arg1[%c0, %c0_0, %c0_1] : memref<1x4x896xf32, #tpu.memory_space<vmem>>, vector<1x4x896xf32>
    %1 = vector.shape_cast %0 : vector<1x4x896xf32> to vector<4x896xf32>
    %c0_2 = arith.constant 0 : index
    %c0_3 = arith.constant 0 : index
    %2 = vector.load %arg2[%c0_2, %c0_3] : memref<4x9xf32, #tpu.memory_space<vmem>>, vector<4x9xf32>
    %c0_4 = arith.constant 0 : index
    %c0_5 = arith.constant 0 : index
    %3 = vector.load %arg3[%c0_4, %c0_5] : memref<8x4xf32, #tpu.memory_space<vmem>>, vector<8x4xf32>
    %cst = arith.constant 0.000000e+00 : f32
    %4 = vector.broadcast %cst : f32 to vector<4x768xf32>
    %5 = vector.extract_strided_slice %1 {offsets = [0, 0], sizes = [4, 768], strides = [1, 1]} : vector<4x896xf32> to vector<4x768xf32>
    %6 = vector.extract_strided_slice %2 {offsets = [0, 0], sizes = [4, 1], strides = [1, 1]} : vector<4x9xf32> to vector<4x1xf32>
    %7 = vector.broadcast %6 : vector<4x1xf32> to vector<4x768xf32>
    %8 = arith.mulf %5, %7 : vector<4x768xf32>
    %9 = arith.addf %4, %8 : vector<4x768xf32>
    %10 = vector.extract_strided_slice %1 {offsets = [0, 1], sizes = [4, 768], strides = [1, 1]} : vector<4x896xf32> to vector<4x768xf32>
    %11 = vector.extract_strided_slice %2 {offsets = [0, 1], sizes = [4, 1], strides = [1, 1]} : vector<4x9xf32> to vector<4x1xf32>
    %12 = vector.broadcast %11 : vector<4x1xf32> to vector<4x768xf32>
    %13 = arith.mulf %10, %12 : vector<4x768xf32>
    %14 = arith.addf %9, %13 : vector<4x768xf32>
    %15 = vector.extract_strided_slice %1 {offsets = [0, 2], sizes = [4, 768], strides = [1, 1]} : vector<4x896xf32> to vector<4x768xf32>
    %16 = vector.extract_strided_slice %2 {offsets = [0, 2], sizes = [4, 1], strides = [1, 1]} : vector<4x9xf32> to vector<4x1xf32>
    %17 = vector.broadcast %16 : vector<4x1xf32> to vector<4x768xf32>
    %18 = arith.mulf %15, %17 : vector<4x768xf32>
    %19 = arith.addf %14, %18 : vector<4x768xf32>
    %20 = vector.extract_strided_slice %1 {offsets = [0, 18], sizes = [4, 768], strides = [1, 1]} : vector<4x896xf32> to vector<4x768xf32>
    %21 = vector.extract_strided_slice %2 {offsets = [0, 3], sizes = [4, 1], strides = [1, 1]} : vector<4x9xf32> to vector<4x1xf32>
    %22 = vector.broadcast %21 : vector<4x1xf32> to vector<4x768xf32>
    %23 = arith.mulf %20, %22 : vector<4x768xf32>
    %24 = arith.addf %19, %23 : vector<4x768xf32>
    %25 = vector.extract_strided_slice %1 {offsets = [0, 19], sizes = [4, 768], strides = [1, 1]} : vector<4x896xf32> to vector<4x768xf32>
    %26 = vector.extract_strided_slice %2 {offsets = [0, 4], sizes = [4, 1], strides = [1, 1]} : vector<4x9xf32> to vector<4x1xf32>
    %27 = vector.broadcast %26 : vector<4x1xf32> to vector<4x768xf32>
    %28 = arith.mulf %25, %27 : vector<4x768xf32>
    %29 = arith.addf %24, %28 : vector<4x768xf32>
    %30 = vector.extract_strided_slice %1 {offsets = [0, 20], sizes = [4, 768], strides = [1, 1]} : vector<4x896xf32> to vector<4x768xf32>
    %31 = vector.extract_strided_slice %2 {offsets = [0, 5], sizes = [4, 1], strides = [1, 1]} : vector<4x9xf32> to vector<4x1xf32>
    %32 = vector.broadcast %31 : vector<4x1xf32> to vector<4x768xf32>
    %33 = arith.mulf %30, %32 : vector<4x768xf32>
    %34 = arith.addf %29, %33 : vector<4x768xf32>
    %35 = vector.extract_strided_slice %1 {offsets = [0, 36], sizes = [4, 768], strides = [1, 1]} : vector<4x896xf32> to vector<4x768xf32>
    %36 = vector.extract_strided_slice %2 {offsets = [0, 6], sizes = [4, 1], strides = [1, 1]} : vector<4x9xf32> to vector<4x1xf32>
    %37 = vector.broadcast %36 : vector<4x1xf32> to vector<4x768xf32>
    %38 = arith.mulf %35, %37 : vector<4x768xf32>
    %39 = arith.addf %34, %38 : vector<4x768xf32>
    %40 = vector.extract_strided_slice %1 {offsets = [0, 37], sizes = [4, 768], strides = [1, 1]} : vector<4x896xf32> to vector<4x768xf32>
    %41 = vector.extract_strided_slice %2 {offsets = [0, 7], sizes = [4, 1], strides = [1, 1]} : vector<4x9xf32> to vector<4x1xf32>
    %42 = vector.broadcast %41 : vector<4x1xf32> to vector<4x768xf32>
    %43 = arith.mulf %40, %42 : vector<4x768xf32>
    %44 = arith.addf %39, %43 : vector<4x768xf32>
    %45 = vector.extract_strided_slice %1 {offsets = [0, 38], sizes = [4, 768], strides = [1, 1]} : vector<4x896xf32> to vector<4x768xf32>
    %46 = vector.extract_strided_slice %2 {offsets = [0, 8], sizes = [4, 1], strides = [1, 1]} : vector<4x9xf32> to vector<4x1xf32>
    %47 = vector.broadcast %46 : vector<4x1xf32> to vector<4x768xf32>
    %48 = arith.mulf %45, %47 : vector<4x768xf32>
    %49 = arith.addf %44, %48 : vector<4x768xf32>
    %cst_6 = arith.constant 0.000000e+00 : f32
    %50 = vector.broadcast %cst_6 : f32 to vector<8x768xf32>
    %51 = vector.extract_strided_slice %3 {offsets = [0, 0], sizes = [8, 1], strides = [1, 1]} : vector<8x4xf32> to vector<8x1xf32>
    %52 = vector.extract_strided_slice %49 {offsets = [0, 0], sizes = [1, 768], strides = [1, 1]} : vector<4x768xf32> to vector<1x768xf32>
    %53 = vector.broadcast %51 : vector<8x1xf32> to vector<8x768xf32>
    %54 = vector.broadcast %52 : vector<1x768xf32> to vector<8x768xf32>
    %55 = arith.mulf %53, %54 : vector<8x768xf32>
    %56 = arith.addf %50, %55 : vector<8x768xf32>
    %57 = vector.extract_strided_slice %3 {offsets = [0, 1], sizes = [8, 1], strides = [1, 1]} : vector<8x4xf32> to vector<8x1xf32>
    %58 = vector.extract_strided_slice %49 {offsets = [1, 0], sizes = [1, 768], strides = [1, 1]} : vector<4x768xf32> to vector<1x768xf32>
    %59 = vector.broadcast %57 : vector<8x1xf32> to vector<8x768xf32>
    %60 = vector.broadcast %58 : vector<1x768xf32> to vector<8x768xf32>
    %61 = arith.mulf %59, %60 : vector<8x768xf32>
    %62 = arith.addf %56, %61 : vector<8x768xf32>
    %63 = vector.extract_strided_slice %3 {offsets = [0, 2], sizes = [8, 1], strides = [1, 1]} : vector<8x4xf32> to vector<8x1xf32>
    %64 = vector.extract_strided_slice %49 {offsets = [2, 0], sizes = [1, 768], strides = [1, 1]} : vector<4x768xf32> to vector<1x768xf32>
    %65 = vector.broadcast %63 : vector<8x1xf32> to vector<8x768xf32>
    %66 = vector.broadcast %64 : vector<1x768xf32> to vector<8x768xf32>
    %67 = arith.mulf %65, %66 : vector<8x768xf32>
    %68 = arith.addf %62, %67 : vector<8x768xf32>
    %69 = vector.extract_strided_slice %3 {offsets = [0, 3], sizes = [8, 1], strides = [1, 1]} : vector<8x4xf32> to vector<8x1xf32>
    %70 = vector.extract_strided_slice %49 {offsets = [3, 0], sizes = [1, 768], strides = [1, 1]} : vector<4x768xf32> to vector<1x768xf32>
    %71 = vector.broadcast %69 : vector<8x1xf32> to vector<8x768xf32>
    %72 = vector.broadcast %70 : vector<1x768xf32> to vector<8x768xf32>
    %73 = arith.mulf %71, %72 : vector<8x768xf32>
    %74 = arith.addf %68, %73 : vector<8x768xf32>
    %c0_7 = arith.constant 0 : index
    %c0_8 = arith.constant 0 : index
    %c0_9 = arith.constant 0 : index
    %75 = vector.load %arg4[%c0_7, %c0_8, %c0_9] : memref<1x8x768xf32, #tpu.memory_space<vmem>>, vector<1x8x768xf32>
    %76 = vector.shape_cast %75 : vector<1x8x768xf32> to vector<8x768xf32>
    %77 = vector.shape_cast %74 : vector<8x768xf32> to vector<1x8x768xf32>
    tpu.vector_store %arg4[%c0_7, %c0_8, %c0_9], %77 {strides = array<i32>} : memref<1x8x768xf32, #tpu.memory_space<vmem>>, vector<1x8x768xf32>,
    return
  }
  func.func @transform_0(%arg0: i32) -> (i32, i32, i32) {
    %c0_i32 = arith.constant 0 : i32
    %c0_i32_0 = arith.constant 0 : i32
    %c0_i32_1 = arith.constant 0 : i32
    return %arg0, %c0_i32, %c0_i32_0 : i32, i32, i32
  }
  func.func @transform_1(%arg0: i32) -> (i32, i32) {
    %c0_i32 = arith.constant 0 : i32
    %c0_i32_0 = arith.constant 0 : i32
    %c0_i32_1 = arith.constant 0 : i32
    return %c0_i32, %c0_i32_0 : i32, i32
  }
  func.func @transform_2(%arg0: i32) -> (i32, i32) {
    %c0_i32 = arith.constant 0 : i32
    %c0_i32_0 = arith.constant 0 : i32
    %c0_i32_1 = arith.constant 0 : i32
    return %c0_i32, %c0_i32_0 : i32, i32
  }
  func.func @transform_3(%arg0: i32) -> (i32, i32, i32) {
    %c0_i32 = arith.constant 0 : i32
    %c0_i32_0 = arith.constant 0 : i32
    %c0_i32_1 = arith.constant 0 : i32
    return %arg0, %c0_i32, %c0_i32_0 : i32, i32, i32
  }
}

</mosaic_0001>

<bundles_post_ra>
// kernel: tpu_custom_call.1
= control target key start
LH: loop header
LB: loop body
LE: loop exit
PB: predicated region body
PF: predicated region fallthrough
CT: control target
= control target key end

     0   :  { %8 = vsyncpa [#allocation3], 0  ;;  %s1079_s0 = inlined_call_operand.hbm [shape: f32[1,4,896], index: 0, kind: input, shape index: {}]   ;;  %s1080_s1 = inlined_call_operand.vmem [shape: f32[4,9], index: 1, kind: input, shape index: {}]   ;;  %s1081_s2 = inlined_call_operand.vmem [shape: f32[8,4], index: 2, kind: input, shape index: {}]   ;;  %s1082_s3 = inlined_call_operand.hbm [shape: f32[1,8,768], index: 3, kind: output, shape index: {}]  }
   0x1   :  { %9 = vsyncpa [#allocation4], 0  ;;  %s790_s12 = smov [#allocation2]   ;;  %s742_s16 = scalar_lea.hbm %s1079_s0, 448 }
   0x2   :  { %s16_s13 = sshll.u32 %s790_s12, 4  ;;  %p743_p0 = scmp.ne.s32.totalorder %s1079_s0, %s742_s16  ;;  %s17_s13 = int_to_ptr.vmem [resolvable:$true] %s16_s13 }
   0x3   :  { %p746_p1 = scmp.lt.u32.totalorder %s742_s16, %s1079_s0 }
   0x5   :  { %p748_p2 = pnand %p746_p1, %p743_p0 }
   0x7   :  { %751 = shalt.err (!%p748_p2)
}
   0x8   :  { %s752_s21 = scalar_lea.vmem %s17_s13, 448  ;;  %p757_p4 = scmp.lt.s32.totalorder %s17_s13, %s17_s13 }
   0x9   :  { %p753_p3 = scmp.ne.s32.totalorder %s17_s13, %s752_s21  ;;  %p758_p5 = scmp.lt.s32.totalorder %s752_s21, %s752_s21 }
   0xb   :  { %p759_p6 = por %p758_p5, %p757_p4 }
   0xd   :  { %p760_p7 = pnand %p759_p6, %p753_p3 }
   0xf   :  { %763 = shalt.err (!%p760_p7)
}
  0x10   :  { %19 = dma.hbm_to_vmem [thread:$0]  %s1079_s0, 448, %s17_s13, [#allocation3]  }
  0x11   :  { %786 = dma.done.wait [#allocation3], 448  }
  0x12   :  { %787 = vsyncadd [#allocation3], 4294966848  ;;  %v791_v0 = vmov 1   ;;  %v792_v1 = vmov 3   ;;  %v31_v2 = vld [vmem:[%s1080_s1] sm:$0xf]  ;;  %v40_v12 = vlaneseq }
  0x13   :  { %729 = vset.pattern.permute.xlu0 %v791_v0  ;;  %731 = vset.pattern.permute.xlu1 %v792_v1  ;;  %v793_v3 = vmov 2   ;;  %v794_v4 = vmov 4   ;;  %v795_v5 = vmov 5   ;;  %v796_v6 = vmov 6   ;;  %v852_v17 = vld [vmem:[#allocation2 + $0x10] sm:$0xff]  ;;  %v854_v18 = vld [vmem:[#allocation2] sm:$0xff] }
  0x14   :  { %52 = vperm.xlu0 %729, %v31_v2   ;;  %141 = vperm.xlu1 %731, %v31_v2   ;;  %v797_v7 = vmov 7   ;;  %v798_v8 = vmov 0   ;;  %v799_v9 = vmov 8   ;;  %v800_v10 = vmov 839922192   ;;  %v859_v22 = vld [vmem:[#allocation2 + $0x8] sm:$0xff] }
  0x15   :  { %v38_v11 = vunpack.c.l.s4 %v800_v10  ;;  %v847_v14 = vshrl.u32 %v40_v12, 7  ;;  %s801_s0 = smov 127   ;;  %v864_v28 = vld [vmem:[#allocation2 + $0x18] sm:$0xf]  ;;  %s802_s1 = smov 126   ;;  %v32_v10 = vld [vmem:[%s1081_s2] sm:$0xff] }
  0x16   :  { %s803_s26 = smov 110   ;;  %s804_s27 = smov 109   ;;  %vm82_vm0 = vcmask 1043456   ;;  %vm84_vm1 = vcmask 1039360   ;;  %vm128_vm2 = vcmask 1031168   ;;  %vm172_vm3 = vcmask 900096  }
  0x17   :  { %v39_v13 = vunpack.c.0.s8 %v38_v11  ;;  %s805_s28 = smov 108   ;;  %s806_s29 = smov 92   ;;  %vm216_vm4 = vcmask 891904   ;;  %vm260_vm5 = vcmask 883712   ;;  %vm304_vm6 = vcmask 752640  }
  0x18   :  { %730 = vset.pattern.permute.xlu0 %v793_v3  ;;  %732 = vset.pattern.permute.xlu1 %v794_v4  ;;  %s807_s30 = smov 91   ;;  %s808_s4 = smov 90   ;;  %vm348_vm7 = vcmask 744448   ;;  %vm392_vm8 = vcmask 736256  }
  0x19   :  { %97 = vperm.xlu0 %730, %v31_v2   ;;  %185 = vperm.xlu1 %732, %v31_v2   ;;  %v850_v15 = vsub.s32 %v39_v13, %v847_v14  ;;  %s809_s2 = smov [#allocation5]  }
  0x1a   :  { %s700_s7 = sshll.u32 %s809_s2, 4  ;;  %s701_s7 = int_to_ptr.vmem [resolvable:$true] %s700_s7 }
  0x1b   :  { %s764_s8 = scalar_lea.vmem %s701_s7, 768  ;;  %p769_p9 = scmp.lt.s32.totalorder %s701_s7, %s701_s7 }
  0x1c   :  { %p765_p8 = scmp.ne.s32.totalorder %s701_s7, %s764_s8  ;;  %p770_p10 = scmp.lt.s32.totalorder %s764_s8, %s764_s8 }
  0x1d   :  { %733 = vset.pattern.permute.xlu1 %v795_v5  ;;  %734 = vset.pattern.permute.xlu0 %v796_v6 }
  0x1e   :  { %229 = vperm.xlu1 %733, %v31_v2   ;;  %273 = vperm.xlu0 %734, %v31_v2   ;;  %p771_p11 = por %p770_p10, %p769_p9 }
  0x20   :  { %p772_p12 = pnand %p771_p11, %p765_p8 }
  0x22   :  { %735 = vset.pattern.permute.xlu1 %v797_v7  ;;  %737 = vset.pattern.permute.xlu0 %v798_v8 }
  0x23   :  { %317 = vperm.xlu1 %735, %v31_v2   ;;  %35 = vperm.xlu0 %737, %v31_v2  }
  0x27   :  { %736 = vset.pattern.permute.xlu1 %v799_v9 }
  0x28   :  { %361 = vperm.xlu1 %736, %v31_v2  }
  0x2c   :  { %738 = vset.pattern.permute.xlu1 %v791_v0 }
  0x93   :  { %v53_v16 = vpop.permute.xlu0 %52  ;;  %v142_v26 = vpop.permute.xlu1 %141 }
  0x94   :  { %v60_v19 = vrot.slane %v53_v16, %v850_v15  ;;  %v149_v29 = vrot.slane %v142_v26, %v850_v15 }
  0x96   :  { %v64_v20 = vmul.f32 %v60_v19, %v852_v17  ;;  %v62_v21 = vmul.f32 %v60_v19, %v854_v18  ;;  %v63_v25 = vmul.f32 %v60_v19, %v859_v22  ;;  %v65_v31 = vmul.f32 %v60_v19, %v864_v28 }
  0x97   :  { %v151_v33 = vmul.f32 %v149_v29, %v854_v18  ;;  %v153_v39 = vmul.f32 %v149_v29, %v852_v17  ;;  %v152_v45 = vmul.f32 %v149_v29, %v859_v22  ;;  %v154_v49 = vmul.f32 %v149_v29, %v864_v28 }
  0x98   :  { %v98_v23 = vpop.permute.xlu0 %97  ;;  %74 = vrot.lane.b32.xlu0 %v64_v20, %s801_s0  ;;  %70 = vrot.lane.b32.xlu1 %v62_v21, %s801_s0  ;;  %v186_v35 = vpop.permute.xlu1 %185 }
  0x99   :  { %v105_v24 = vrot.slane %v98_v23, %v850_v15  ;;  %v193_v38 = vrot.slane %v186_v35, %v850_v15 }
  0x9b   :  { %v107_v27 = vmul.f32 %v105_v24, %v854_v18  ;;  %v109_v30 = vmul.f32 %v105_v24, %v852_v17  ;;  %v108_v34 = vmul.f32 %v105_v24, %v859_v22  ;;  %v110_v40 = vmul.f32 %v105_v24, %v864_v28 }
  0x9c   :  { %72 = vrot.lane.b32.xlu1 %v63_v25, %s801_s0  ;;  %v195_v44 = vmul.f32 %v193_v38, %v854_v18  ;;  %v197_v48 = vmul.f32 %v193_v38, %v852_v17  ;;  %v196_v51 = vmul.f32 %v193_v38, %v859_v22  ;;  %v198_v54 = vmul.f32 %v193_v38, %v864_v28 }
  0x9d   :  { %115 = vrot.lane.b32.xlu0 %v107_v27, %s802_s1  ;;  %v274_v32 = vpop.permute.xlu0 %273  ;;  %v230_v46 = vpop.permute.xlu1 %229 }
  0x9e   :  { %v237_v47 = vrot.slane %v230_v46, %v850_v15  ;;  %v281_v52 = vrot.slane %v274_v32, %v850_v15 }
  0xa0   :  { %76 = vrot.lane.b32.xlu1 %v65_v31, %s801_s0  ;;  %v239_v50 = vmul.f32 %v237_v47, %v854_v18  ;;  %v241_v53 = vmul.f32 %v237_v47, %v852_v17  ;;  %v283_v55 = vmul.f32 %v281_v52, %v854_v18  ;;  %v240_v56 = vmul.f32 %v237_v47, %v859_v22 }
  0xa1   :  { %119 = vrot.lane.b32.xlu0 %v109_v30, %s802_s1  ;;  %v285_v59 = vmul.f32 %v281_v52, %v852_v17  ;;  %v242_v60 = vmul.f32 %v237_v47, %v864_v28  ;;  %v284_v62 = vmul.f32 %v281_v52, %v859_v22  ;;  %v286_v4 = vmul.f32 %v281_v52, %v864_v28 }
  0xa2   :  { %v36_v36 = vpop.permute.xlu0 %35  ;;  %v318_v57 = vpop.permute.xlu1 %317 }
  0xa3   :  { %v43_v37 = vrot.slane %v36_v36, %v850_v15  ;;  %v325_v58 = vrot.slane %v318_v57, %v850_v15 }
  0xa4   :  { %117 = vrot.lane.b32.xlu1 %v108_v34, %s802_s1 }
  0xa5   :  { %159 = vrot.lane.b32.xlu0 %v151_v33, %s803_s26  ;;  %v876_v41 = vmul.f32 %v43_v37, %v854_v18  ;;  %v879_v42 = vmul.f32 %v43_v37, %v852_v17  ;;  %v882_v43 = vmul.f32 %v43_v37, %v859_v22  ;;  %v327_v61 = vmul.f32 %v325_v58, %v854_v18 }
  0xa6   :  { %v329_v2 = vmul.f32 %v325_v58, %v852_v17  ;;  %v328_v6 = vmul.f32 %v325_v58, %v859_v22  ;;  %v330_v8 = vmul.f32 %v325_v58, %v864_v28 }
  0xa7   :  { %v362_v63 = vpop.permute.xlu1 %361 }
  0xa8   :  { %121 = vrot.lane.b32.xlu1 %v110_v40, %s802_s1  ;;  %v369_v0 = vrot.slane %v362_v63, %v850_v15 }
  0xa9   :  { %163 = vrot.lane.b32.xlu0 %v153_v39, %s803_s26 }
  0xaa   :  { %v371_v5 = vmul.f32 %v369_v0, %v854_v18  ;;  %v373_v7 = vmul.f32 %v369_v0, %v852_v17  ;;  %v372_v9 = vmul.f32 %v369_v0, %v859_v22  ;;  %v374_v11 = vmul.f32 %v369_v0, %v864_v28 }
  0xac   :  { %161 = vrot.lane.b32.xlu1 %v152_v45, %s803_s26 }
  0xad   :  { %203 = vrot.lane.b32.xlu0 %v195_v44, %s804_s27 }
  0xb0   :  { %165 = vrot.lane.b32.xlu1 %v154_v49, %s803_s26 }
  0xb1   :  { %207 = vrot.lane.b32.xlu0 %v197_v48, %s804_s27 }
  0xb4   :  { %205 = vrot.lane.b32.xlu1 %v196_v51, %s804_s27 }
  0xb5   :  { %247 = vrot.lane.b32.xlu0 %v239_v50, %s805_s28 }
  0xb8   :  { %209 = vrot.lane.b32.xlu1 %v198_v54, %s804_s27 }
  0xb9   :  { %251 = vrot.lane.b32.xlu0 %v241_v53, %s805_s28 }
  0xbc   :  { %249 = vrot.lane.b32.xlu1 %v240_v56, %s805_s28 }
  0xbd   :  { %291 = vrot.lane.b32.xlu0 %v283_v55, %s806_s29 }
  0xc0   :  { %253 = vrot.lane.b32.xlu1 %v242_v60, %s805_s28 }
  0xc1   :  { %295 = vrot.lane.b32.xlu0 %v285_v59, %s806_s29 }
  0xc4   :  { %293 = vrot.lane.b32.xlu1 %v284_v62, %s806_s29 }
  0xc5   :  { %335 = vrot.lane.b32.xlu0 %v327_v61, %s807_s30 }
  0xc8   :  { %297 = vrot.lane.b32.xlu1 %v286_v4, %s806_s29 }
  0xc9   :  { %339 = vrot.lane.b32.xlu0 %v329_v2, %s807_s30 }
  0xcc   :  { %337 = vrot.lane.b32.xlu1 %v328_v6, %s807_s30 }
  0xcd   :  { %379 = vrot.lane.b32.xlu0 %v371_v5, %s808_s4 }
  0xd0   :  { %341 = vrot.lane.b32.xlu1 %v330_v8, %s807_s30 }
  0xd1   :  { %383 = vrot.lane.b32.xlu0 %v373_v7, %s808_s4 }
  0xd4   :  { %381 = vrot.lane.b32.xlu1 %v372_v9, %s808_s4 }
  0xd5   :  { %406 = vperm.xlu0 %737, %v32_v10  }
  0xd8   :  { %385 = vrot.lane.b32.xlu1 %v374_v11, %s808_s4 }
  0xd9   :  { %739 = vset.pattern.permute.xlu0 %v793_v3 }
  0xda   :  { %549 = vperm.xlu0 %739, %v32_v10  }
  0xdc   :  { %479 = vperm.xlu1 %738, %v32_v10  }
  0xde   :  { %741 = vset.pattern.permute.xlu0 %v792_v1 }
  0xe0   :  { %740 = vset.pattern.permute.xlu1 %v792_v1 }
  0xe1   :  { %619 = vperm.xlu1 %740, %v32_v10  }
 0x10a   :  { %v71_v12 = vpop.permute.xlu1 %70  ;;  %v75_v13 = vpop.permute.xlu0 %74 }
 0x10b   :  { %v78_v31 = vrot.slane %v71_v12, 4  ;;  %v80_v35 = vrot.slane %v75_v13, 4 }
 0x10e   :  { %v73_v15 = vpop.permute.xlu1 %72 }
 0x10f   :  { %v116_v16 = vpop.permute.xlu0 %115  ;;  %v79_v29 = vrot.slane %v73_v15, 4 }
 0x110   :  { %v123_v37 = vrot.slane %v116_v16, 4 }
 0x111   :  { %v83_v36 = vsel %vm82_vm0, %v78_v31, %v79_v29  ;;  %v86_v39 = vsel %vm82_vm0, %v79_v29, %v80_v35 }
 0x112   :  { %v77_v17 = vpop.permute.xlu1 %76  ;;  %v85_v49 = vsel %vm84_vm1, %v71_v12, %v83_v36  ;;  %v87_v52 = vsel %vm84_vm1, %v73_v15, %v86_v39 }
 0x113   :  { %v120_v18 = vpop.permute.xlu0 %119  ;;  %v81_v32 = vrot.slane %v77_v17, 4  ;;  %v93_v61 = vadd.f32 %v85_v49, %v876_v41  ;;  %v94_v6 = vadd.f32 %v87_v52, %v882_v43 }
 0x114   :  { %v125_v46 = vrot.slane %v120_v18, 4 }
 0x115   :  { %v88_v45 = vsel %vm82_vm0, %v80_v35, %v81_v32 }
 0x116   :  { %v118_v19 = vpop.permute.xlu1 %117  ;;  %v89_v56 = vsel %vm84_vm1, %v75_v13, %v88_v45 }
 0x117   :  { %v160_v20 = vpop.permute.xlu0 %159  ;;  %v124_v33 = vrot.slane %v118_v19, 4  ;;  %v95_v7 = vadd.f32 %v89_v56, %v879_v42 }
 0x118   :  { %v167_v50 = vrot.slane %v160_v20, 4 }
 0x119   :  { %v127_v47 = vsel %vm82_vm0, %v123_v37, %v124_v33  ;;  %v130_v53 = vsel %vm82_vm0, %v124_v33, %v125_v46 }
 0x11a   :  { %v122_v21 = vpop.permute.xlu1 %121  ;;  %v129_v57 = vsel %vm128_vm2, %v116_v16, %v127_v47  ;;  %v131_v0 = vsel %vm128_vm2, %v118_v19, %v130_v53 }
 0x11b   :  { %v916_v22 = vpop.permute.xlu0 %163  ;;  %v126_v38 = vrot.slane %v122_v21, 4  ;;  %v137_v41 = vadd.f32 %v129_v57, %v93_v61  ;;  %v138_v15 = vadd.f32 %v131_v0, %v94_v6 }
 0x11c   :  { %v169_v55 = vrot.slane %v916_v22, 4 }
 0x11d   :  { %v132_v54 = vsel %vm82_vm0, %v125_v46, %v126_v38 }
 0x11e   :  { %v162_v23 = vpop.permute.xlu1 %161  ;;  %v133_v2 = vsel %vm128_vm2, %v120_v18, %v132_v54 }
 0x11f   :  { %v918_v3 = vpop.permute.xlu0 %203  ;;  %v168_v40 = vrot.slane %v162_v23, 4  ;;  %v139_v16 = vadd.f32 %v133_v2, %v95_v7 }
 0x120   :  { %v211_v4 = vrot.slane %v918_v3, 4 }
 0x121   :  { %v171_v58 = vsel %vm82_vm0, %v167_v50, %v168_v40  ;;  %v174_v62 = vsel %vm82_vm0, %v168_v40, %v169_v55 }
 0x122   :  { %v166_v24 = vpop.permute.xlu1 %165  ;;  %v173_v8 = vsel %vm172_vm3, %v160_v20, %v171_v58  ;;  %v175_v9 = vsel %vm172_vm3, %v162_v23, %v174_v62 }
 0x123   :  { %v920_v25 = vpop.permute.xlu0 %207  ;;  %v170_v51 = vrot.slane %v166_v24, 4  ;;  %v181_v23 = vadd.f32 %v173_v8, %v137_v41  ;;  %v182_v24 = vadd.f32 %v175_v9, %v138_v15 }
 0x124   :  { %v213_v10 = vrot.slane %v920_v25, 4 }
 0x125   :  { %v176_v5 = vsel %vm82_vm0, %v169_v55, %v170_v51 }
 0x126   :  { %v922_v26 = vpop.permute.xlu1 %205  ;;  %v177_v43 = vsel %vm172_vm3, %v916_v22, %v176_v5 }
 0x127   :  { %v924_v1 = vpop.permute.xlu0 %247  ;;  %v212_v59 = vrot.slane %v922_v26, 4  ;;  %v183_v36 = vadd.f32 %v177_v43, %v139_v16 }
 0x128   :  { %v255_v19 = vrot.slane %v924_v1, 4 }
 0x129   :  { %v215_v11 = vsel %vm82_vm0, %v211_v4, %v212_v59  ;;  %v218_v18 = vsel %vm82_vm0, %v212_v59, %v213_v10 }
 0x12a   :  { %v926_v27 = vpop.permute.xlu1 %209  ;;  %v217_v29 = vsel %vm216_vm4, %v918_v3, %v215_v11  ;;  %v219_v37 = vsel %vm216_vm4, %v922_v26, %v218_v18 }
 0x12b   :  { %v928_v28 = vpop.permute.xlu0 %251  ;;  %v214_v42 = vrot.slane %v926_v27, 4  ;;  %v225_v49 = vadd.f32 %v217_v29, %v181_v23  ;;  %v226_v26 = vadd.f32 %v219_v37, %v182_v24 }
 0x12c   :  { %v257_v20 = vrot.slane %v928_v28, 4 }
 0x12d   :  { %v220_v38 = vsel %vm82_vm0, %v213_v10, %v214_v42 }
 0x12e   :  { %v930_v30 = vpop.permute.xlu1 %249  ;;  %v221_v52 = vsel %vm216_vm4, %v920_v25, %v220_v38 }
 0x12f   :  { %v932_v34 = vpop.permute.xlu0 %291  ;;  %v256_v12 = vrot.slane %v930_v30, 4  ;;  %v227_v25 = vadd.f32 %v221_v52, %v183_v36 }
 0x130   :  { %v299_v31 = vrot.slane %v932_v34, 4 }
 0x131   :  { %v259_v32 = vsel %vm82_vm0, %v255_v19, %v256_v12  ;;  %v262_v22 = vsel %vm82_vm0, %v256_v12, %v257_v20  ;;  %v418_v12 = vsub.s32 4, %v847_v14 }
 0x132   :  { %v936_v44 = vpop.permute.xlu1 %253  ;;  %v263_v50 = vsel %vm260_vm5, %v930_v30, %v262_v22 }
 0x133   :  { %v940_v48 = vpop.permute.xlu0 %295  ;;  %v258_v27 = vrot.slane %v936_v44, 4  ;;  %v261_v44 = vsel %vm260_vm5, %v924_v1, %v259_v32  ;;  %v270_v30 = vadd.f32 %v263_v50, %v226_v26  ;;  %v1022_v32 = vsub.s32 3, %v847_v14 }
 0x134   :  { %v301_v33 = vrot.slane %v940_v48, 4  ;;  %v269_v59 = vadd.f32 %v261_v44, %v225_v49 }
 0x135   :  { %v264_v53 = vsel %vm82_vm0, %v257_v20, %v258_v27  ;;  %v558_v20 = vsub.s32 6, %v847_v14 }
 0x136   :  { %v294_v60 = vpop.permute.xlu1 %293  ;;  %v265_v0 = vsel %vm260_vm5, %v928_v28, %v264_v53 }
 0x137   :  { %v953_v63 = vpop.permute.xlu0 %335  ;;  %v300_v21 = vrot.slane %v294_v60, 4  ;;  %v271_v11 = vadd.f32 %v265_v0, %v227_v25 }
 0x138   :  { %v343_v46 = vrot.slane %v953_v63, 4 }
 0x139   :  { %v303_v3 = vsel %vm82_vm0, %v299_v31, %v300_v21  ;;  %v306_v45 = vsel %vm82_vm0, %v300_v21, %v301_v33  ;;  %v488_v31 = vsub.s32 5, %v847_v14 }
 0x13a   :  { %v298_v13 = vpop.permute.xlu1 %297  ;;  %v305_v56 = vsel %vm304_vm6, %v932_v34, %v303_v3  ;;  %v307_v57 = vsel %vm304_vm6, %v294_v60, %v306_v45  ;;  %v414_v34 = vsub.s32 0, %v847_v14 }
 0x13b   :  { %v340_v17 = vpop.permute.xlu0 %339  ;;  %v302_v47 = vrot.slane %v298_v13, 4  ;;  %v313_v4 = vadd.f32 %v305_v56, %v269_v59  ;;  %v314_v60 = vadd.f32 %v307_v57, %v270_v30 }
 0x13c   :  { %v345_v51 = vrot.slane %v340_v17, 4 }
 0x13d   :  { %v308_v61 = vsel %vm82_vm0, %v301_v33, %v302_v47 }
 0x13e   :  { %v338_v35 = vpop.permute.xlu1 %337  ;;  %v309_v41 = vsel %vm304_vm6, %v940_v48, %v308_v61 }
 0x13f   :  { %v344_v39 = vrot.slane %v338_v35, 4  ;;  %v380_v40 = vpop.permute.xlu0 %379  ;;  %v315_v42 = vadd.f32 %v309_v41, %v271_v11 }
 0x140   :  { %v387_v8 = vrot.slane %v380_v40, 4 }
 0x141   :  { %v347_v54 = vsel %vm82_vm0, %v343_v46, %v344_v39  ;;  %v350_v1 = vsel %vm82_vm0, %v344_v39, %v345_v51  ;;  %v1035_v46 = vsub.s32 7, %v847_v14 }
 0x142   :  { %v342_v55 = vpop.permute.xlu1 %341  ;;  %v349_v2 = vsel %vm348_vm7, %v953_v63, %v347_v54  ;;  %v351_v5 = vsel %vm348_vm7, %v338_v35, %v350_v1  ;;  %v554_v63 = vsub.s32 2, %v847_v14 }
 0x143   :  { %v346_v58 = vrot.slane %v342_v55, 4  ;;  %v384_v62 = vpop.permute.xlu0 %383  ;;  %v357_v28 = vadd.f32 %v349_v2, %v313_v4  ;;  %v358_v13 = vadd.f32 %v351_v5, %v314_v60 }
 0x144   :  { %v389_v9 = vrot.slane %v384_v62, 4 }
 0x145   :  { %v352_v6 = vsel %vm82_vm0, %v345_v51, %v346_v58 }
 0x146   :  { %v382_v7 = vpop.permute.xlu1 %381  ;;  %v353_v15 = vsel %vm348_vm7, %v340_v17, %v352_v6  ;;  %v484_v17 = vsub.s32 1, %v847_v14 }
 0x147   :  { %v388_v10 = vrot.slane %v382_v7, 4  ;;  %v359_v29 = vadd.f32 %v353_v15, %v315_v42 }
 0x149   :  { %v391_v16 = vsel %vm82_vm0, %v387_v8, %v388_v10  ;;  %v394_v43 = vsel %vm82_vm0, %v388_v10, %v389_v9 }
 0x14a   :  { %v393_v18 = vsel %vm392_vm8, %v380_v40, %v391_v16  ;;  %v395_v48 = vsel %vm392_vm8, %v382_v7, %v394_v43  ;;  %v386_v19 = vpop.permute.xlu1 %385 }
 0x14b   :  { %v1015_v21 = vadd.f32 %v393_v18, %v357_v28  ;;  %v1017_v23 = vadd.f32 %v395_v48, %v358_v13  ;;  %v390_v24 = vrot.slane %v386_v19, 4 }
 0x14d   :  { %v396_v22 = vsel %vm82_vm0, %v389_v9, %v390_v24  ;;  %v415_v27 = vrot.slane %v1015_v21, %v414_v34  ;;  %v419_v33 = vrot.slane %v1015_v21, %v418_v12  ;;  %v423_v35 = vrot.slane %v1017_v23, %v414_v34 }
 0x14e   :  { %v397_v36 = vsel %vm392_vm8, %v384_v62, %v396_v22  ;;  %v427_v37 = vrot.slane %v1017_v23, %v418_v12  ;;  %v555_v38 = vrot.slane %v1015_v21, %v554_v63  ;;  %v559_v39 = vrot.slane %v1015_v21, %v558_v20 }
 0x14f   :  { %v1032_v40 = vadd.f32 %v397_v36, %v359_v29  ;;  %v445_v3 = vrot.slane %v415_v27, %v414_v34  ;;  %v449_v45 = vrot.slane %v419_v33, %v414_v34  ;;  %v453_v47 = vrot.slane %v423_v35, %v414_v34 }
 0x150   :  { %v457_v49 = vrot.slane %v427_v37, %v414_v34  ;;  %v563_v44 = vrot.slane %v1017_v23, %v554_v63  ;;  %v567_v50 = vrot.slane %v1017_v23, %v558_v20  ;;  %v585_v54 = vrot.slane %v555_v38, %v554_v63 }
 0x151   :  { %v431_v51 = vrot.slane %v1032_v40, %v414_v34  ;;  %v435_v26 = vrot.slane %v1032_v40, %v418_v12  ;;  %v571_v52 = vrot.slane %v1032_v40, %v554_v63  ;;  %v575_v53 = vrot.slane %v1032_v40, %v558_v20 }
 0x152   :  { %v589_v55 = vrot.slane %v559_v39, %v554_v63  ;;  %v593_v56 = vrot.slane %v563_v44, %v554_v63  ;;  %v493_v14 = vrot.slane %v1017_v23, %v484_v17  ;;  %v597_v58 = vrot.slane %v567_v50, %v554_v63 }
 0x153   :  { %v461_v57 = vrot.slane %v431_v51, %v414_v34  ;;  %v465_v1 = vrot.slane %v435_v26, %v414_v34  ;;  %v601_v59 = vrot.slane %v571_v52, %v554_v63  ;;  %v605_v61 = vrot.slane %v575_v53, %v554_v63 }
 0x154   :  { %v407_v30 = vpop.permute.xlu0 %406  ;;  %v497_v62 = vrot.slane %v1017_v23, %v488_v31  ;;  %v501_v25 = vrot.slane %v1032_v40, %v484_v17  ;;  %v505_v0 = vrot.slane %v1032_v40, %v488_v31  ;;  %v523_v5 = vrot.slane %v493_v14, %v484_v17 }
 0x155   :  { %v466_v2 = vmul.f32 %v445_v3, %v407_v30  ;;  %v467_v4 = vmul.f32 %v449_v45, %v407_v30  ;;  %v468_v60 = vmul.f32 %v453_v47, %v407_v30  ;;  %v469_v6 = vmul.f32 %v457_v49, %v407_v30 }
 0x156   :  { %v470_v7 = vmul.f32 %v461_v57, %v407_v30  ;;  %v471_v41 = vmul.f32 %v465_v1, %v407_v30  ;;  %v527_v8 = vrot.slane %v497_v62, %v484_v17  ;;  %v531_v9 = vrot.slane %v501_v25, %v484_v17 }
 0x157   :  { %v485_v34 = vrot.slane %v1015_v21, %v484_v17  ;;  %v489_v10 = vrot.slane %v1015_v21, %v488_v31  ;;  %v633_v11 = vrot.slane %v1017_v23, %v1022_v32  ;;  %v535_v28 = vrot.slane %v505_v0, %v484_v17 }
 0x158   :  { %v637_v12 = vrot.slane %v1017_v23, %v1035_v46  ;;  %v641_v63 = vrot.slane %v1032_v40, %v1022_v32  ;;  %v645_v13 = vrot.slane %v1032_v40, %v1035_v46  ;;  %v625_v18 = vrot.slane %v1015_v21, %v1022_v32 }
 0x159   :  { %v550_v15 = vpop.permute.xlu0 %549  ;;  %v515_v16 = vrot.slane %v485_v34, %v484_v17  ;;  %v519_v43 = vrot.slane %v489_v10, %v484_v17  ;;  %v663_v42 = vrot.slane %v633_v11, %v1022_v32  ;;  %v629_v23 = vrot.slane %v1015_v21, %v1035_v46 }
 0x15a   :  { %v606_v48 = vmul.f32 %v585_v54, %v550_v15  ;;  %v607_v19 = vmul.f32 %v589_v55, %v550_v15  ;;  %v608_v20 = vmul.f32 %v593_v56, %v550_v15  ;;  %v609_v24 = vmul.f32 %v597_v58, %v550_v15 }
 0x15b   :  { %v610_v29 = vmul.f32 %v601_v59, %v550_v15  ;;  %v611_v31 = vmul.f32 %v605_v61, %v550_v15  ;;  %v480_v22 = vpop.permute.xlu1 %479  ;;  %v667_v27 = vrot.slane %v637_v12, %v1022_v32  ;;  %v671_v39 = vrot.slane %v641_v63, %v1022_v32 }
 0x15c   :  { %v536_v33 = vmul.f32 %v515_v16, %v480_v22  ;;  %v537_v35 = vmul.f32 %v519_v43, %v480_v22  ;;  %v538_v17 = vmul.f32 %v523_v5, %v480_v22  ;;  %v539_v36 = vmul.f32 %v527_v8, %v480_v22 }
 0x15d   :  { %v540_v37 = vmul.f32 %v531_v9, %v480_v22  ;;  %v541_v38 = vmul.f32 %v535_v28, %v480_v22  ;;  %v675_v40 = vrot.slane %v645_v13, %v1022_v32  ;;  %v655_v44 = vrot.slane %v625_v18, %v1022_v32 }
 0x15e   :  { %v542_v3 = vadd.f32 %v536_v33, %v466_v2  ;;  %v543_v45 = vadd.f32 %v537_v35, %v467_v4  ;;  %v544_v47 = vadd.f32 %v538_v17, %v468_v60  ;;  %v545_v21 = vadd.f32 %v539_v36, %v469_v6 }
 0x15f   :  { %v546_v46 = vadd.f32 %v540_v37, %v470_v7  ;;  %v547_v49 = vadd.f32 %v541_v38, %v471_v41  ;;  %v659_v50 = vrot.slane %v629_v23, %v1022_v32 }
 0x160   :  { %v614_v51 = vadd.f32 %v608_v20, %v544_v47  ;;  %v615_v26 = vadd.f32 %v609_v24, %v545_v21  ;;  %v620_v52 = vpop.permute.xlu1 %619  ;;  %v612_v53 = vadd.f32 %v606_v48, %v542_v3  ;;  %v613_v54 = vadd.f32 %v607_v19, %v543_v45 }
 0x161   :  { %v616_v55 = vadd.f32 %v610_v29, %v546_v46  ;;  %v617_v56 = vadd.f32 %v611_v31, %v547_v49  ;;  %v676_v14 = vmul.f32 %v655_v44, %v620_v52  ;;  %v677_v57 = vmul.f32 %v659_v50, %v620_v52 }
 0x162   :  { %v678_v1 = vmul.f32 %v663_v42, %v620_v52  ;;  %v679_v58 = vmul.f32 %v667_v27, %v620_v52  ;;  %v680_v59 = vmul.f32 %v671_v39, %v620_v52  ;;  %v681_v30 = vmul.f32 %v675_v40, %v620_v52 }
 0x163   :  { %v682_v61 = vadd.f32 %v676_v14, %v612_v53  ;;  %v683_v62 = vadd.f32 %v677_v57, %v613_v54 }
 0x164   :  { %v684_v25 = vadd.f32 %v678_v1, %v614_v51  ;;  %v685_v0 = vadd.f32 %v679_v58, %v615_v26  ;;  %v686_v32 = vadd.f32 %v680_v59, %v616_v55  ;;  %v687_v2 = vadd.f32 %v681_v30, %v617_v56 }
 0x165   :  { %688 = vst [vmem:[#allocation5] sm:$0xff] %v682_v61  ;;  %689 = vst [vmem:[#allocation5 + $0x8] sm:$0xff] %v683_v62 }
 0x166   :  { %690 = vst [vmem:[#allocation5 + $0x10] sm:$0xff] %v684_v25  ;;  %691 = vst [vmem:[#allocation5 + $0x18] sm:$0xff] %v685_v0 }
 0x167   :  { %692 = vst [vmem:[#allocation5 + $0x20] sm:$0xff] %v686_v32  ;;  %693 = vst [vmem:[#allocation5 + $0x28] sm:$0xff] %v687_v2 }
 0x168   :  { %775 = shalt.err (!%p772_p12)
}
 0x169   :  { %s776_s11 = scalar_lea.hbm %s1082_s3, 768 }
 0x16a   :  { %p777_p13 = scmp.ne.s32.totalorder %s1082_s3, %s776_s11  ;;  %p780_p0 = scmp.lt.u32.totalorder %s776_s11, %s1082_s3 }
 0x16c   :  { %p782_p1 = pnand %p780_p0, %p777_p13 }
 0x16e   :  { %785 = shalt.err (!%p782_p1)
}
 0x16f   :  { %703 = dma.vmem_to_hbm [thread:$0]  %s701_s7, 768, %s1082_s3, [#allocation4]  }
 0x170   :  { %788 = dma.done.wait [#allocation4], 768  }
 0x171   :  { %789 = vsyncadd [#allocation4], 4294966528 }
 0x172   :  { %707 = vsyncpa [#allocation3], 1 }
 0x173   :  { %708 = vsyncpa [#allocation4], 1 }

</bundles_post_ra>
